<compile_context>
chip_gen: v7x
topology: tpu7x:2x2x1
jax: 0.10.0
libtpu: 0.0.40
codegen_flags: <defaults>
</compile_context>

<pallas_src>
import math

import jax
import jax.numpy as jnp
from jax.experimental import pallas as pl
from jax.experimental.pallas import tpu as pltpu


_MAX_TL = 2048                  # lane tile over the flattened spatial dim
_ADD_MAX_BLOCK_ELEMS = 1 << 20  # max elements per block for the add path


def _round_up(x, m):
    return ((x + m - 1) // m) * m


def _vmem_limit(block_shapes):
    """Scoped-VMEM limit derived from the per-step footprint (x2 double-buffer)."""
    per_step = sum(int(math.prod(s)) * 4 for s in block_shapes)
    return int(min(max(2 * per_step + (8 << 20), 16 << 20), 48 << 20))


# ------------------------------ padding (F.pad logic) ------------------------

def _torch_like_pad(x1, x2):
    """Replicates the F.pad logic of Sum.forward (NCHW inputs)."""
    d = x1.shape[2] - x2.shape[2]
    if d < 0:
        a = math.ceil(abs(d / 2))
        b = math.floor(abs(d / 2))
        x1 = jnp.pad(x1, ((0, 0), (0, 0), (a, b), (a, b)))
    elif d > 0:
        a = math.ceil(abs(d / 2))
        b = math.floor(abs(d / 2))
        x2 = jnp.pad(x2, ((0, 0), (0, 0), (a, b), (a, b)))
    return x1, x2


# -------------------- conv + BN(train) + residual, two passes ----------------

def _conv_bn_add(x1_nchw, x2_nchw, w, gamma, beta):
    """3x3 same-conv -> BatchNorm2d(train) -> + residual, via two Pallas passes.

    Layout: (channels, L) with L = N*(H+2)*(W+2) flattened padded spatial, so
    the lane (last) dim is the long axis and every 3x3 tap is a pure static
    lane shift of the input.  The conv is evaluated at every padded position;
    invalid positions are excluded from the BN statistics by an in-kernel mask
    and discarded by the wrapper slice.
      pass 1: conv + per-block masked partial sum / sum-of-squares (parallel),
      pass 2: conv recomputed (cheaper than an HBM round trip of the conv
              intermediate whenever Cin < 2*Cout) + BN affine + residual add.
    """
    N, Cin, H, W = x1_nchw.shape
    Cout = w.shape[0]
    Hp, Wp = H + 2, W + 2
    L = N * Hp * Wp
    need = 2 * Wp + 2                 # max in-kernel tap offset + 1

    # Tile geometry: TL lanes per block, hw = halo width = smallest multiple of
    # 128 that divides TL and covers `need`.
    TL = _MAX_TL
    if L < TL:
        TL = max(_round_up(L, 128), 128)
    TL = max(TL, _round_up(need, 128))
    hw = TL
    c = 128
    while c < TL:
        if TL % c == 0 and c >= need:
            hw = c
            break
        c += 128

    Lg = _round_up(L, TL)
    grid = Lg // TL
    XL = Lg + hw
    front = Wp + 1                    # tap (kh, kw) reads X column p + kh*Wp + kw
    Mvalid = N * H * W
    hstep = TL // hw

    if Lg >= (1 << 23):
        # TODO(synk): for >8M-position inputs switch the in-kernel mask to exact
        # integer math (or stream a precomputed mask) instead of f32 floor/div.
        raise NotImplementedError("input too large for the f32 in-kernel mask")

    # --- wrapper-side layout plumbing (pure data movement) ---
    # TODO(synk): push the NCHW -> (C, L) transposes into the index_map with a
    # per-batch grid axis to remove these XLA copies entirely.
    xpad = jnp.pad(x1_nchw, ((0, 0), (0, 0), (1, 1), (1, 1)))          # (N,Cin,Hp,Wp)
    X = jnp.pad(jnp.transpose(xpad, (1, 0, 2, 3)).reshape(Cin, L),
                ((0, 0), (front, XL - L - front)))                     # (Cin, XL)
    y2 = jnp.pad(
        jnp.transpose(jnp.pad(x2_nchw, ((0, 0), (0, 0), (1, 1), (1, 1))),
                      (1, 0, 2, 3)).reshape(Cout, L),
        ((0, 0), (0, Lg - L)))                                         # (Cout, Lg)

    # weight (Cout, Cin, 3, 3) -> (Cout, kh, kw, Cin) -> (Cout, 9*Cin)
    w2 = jnp.transpose(w, (0, 2, 3, 1)).reshape(Cout, 9 * Cin)

    # ---- shared in-kernel helpers (close over the Python-int geometry) ----
    def conv_block(xc_ref, xh_ref, w_ref):
        # current block + minimal halo; taps stacked along the contraction axis
        xcat = jnp.concatenate([xc_ref[...], xh_ref[...]], axis=1)     # (Cin, TL+hw)
        taps = jnp.concatenate(
            [xcat[:, kh * Wp + kw: kh * Wp + kw + TL]
             for kh in range(3) for kw in range(3)], axis=0)           # (9*Cin, TL)
        # conv bias intentionally omitted: exactly cancelled by BN mean subtraction
        return jnp.dot(w_ref[...], taps, preferred_element_type=jnp.float32)

    def valid_mask():
        # valid iff col < L, 1 <= col%Wp <= W and 1 <= (col%(Hp*Wp))//Wp <= H.
        # f32 floor/div math; exact for Lg < 2**23 (guarded above).
        base = (pl.program_id(0) * TL).astype(jnp.float32)
        col = (jax.lax.broadcasted_iota(jnp.int32, (1, TL), 1)
               .astype(jnp.float32) + base)
        img = jnp.floor(col / float(Hp * Wp))
        im = col - img * float(Hp * Wp)
        h = jnp.floor(im / float(Wp))
        ww = im - h * float(Wp)
        valid = ((col < float(L)) & (ww >= 1.0) & (ww <= float(W))
                 & (h >= 1.0) & (h <= float(H)))
        return valid.astype(jnp.float32)                               # (1, TL)

    # ---- pass 1: conv + per-block masked partial stats (grid-parallel) ----
    def pass1_kernel(xc_ref, xh_ref, w_ref, s_ref):
        acc = conv_block(xc_ref, xh_ref, w_ref)                        # (Cout, TL)
        am = acc * valid_mask()
        s_sum = jnp.sum(am, axis=1, keepdims=True)                     # (Cout, 1)
        s_sq = jnp.sum(acc * am, axis=1, keepdims=True)                # (Cout, 1)
        lane = jax.lax.broadcasted_iota(jnp.int32, (Cout, 128), 1)
        s_ref[0] = (jnp.where(lane == 0, s_sum, 0.0)
                    + jnp.where(lane == 1, s_sq, 0.0))                 # lane-dense

    stats = pl.pallas_call(
        pass1_kernel,
        out_shape=jax.ShapeDtypeStruct((grid, Cout, 128), jnp.float32),
        grid=(grid,),
        in_specs=[
            pl.BlockSpec((Cin, TL), lambda i: (0, i)),                 # current
            pl.BlockSpec((Cin, hw), lambda i: (0, (i + 1) * hstep)),   # halo
            pl.BlockSpec((Cout, 9 * Cin), lambda i: (0, 0)),           # weights
        ],
        out_specs=pl.BlockSpec((1, Cout, 128), lambda i: (i, 0, 0)),
        compiler_params=pltpu.CompilerParams(
            dimension_semantics=("parallel",),
            vmem_limit_bytes=_vmem_limit(
                [(Cin, TL), (Cin, hw), (Cout, 9 * Cin), (1, Cout, 128)])),
    )(X, X, w2)

    # ---- tiny cross-block reduction + BN scale/shift (plain XLA, O(Cout)) ----
    s = jnp.sum(stats, axis=0)                                         # (Cout, 128)
    mean = s[:, 0] / Mvalid
    # NOTE: E[x^2]-E[x]^2 in f32; adequate at the tested tolerances.
    var = jnp.maximum(s[:, 1] / Mvalid - mean * mean, 0.0)
    inv = jax.lax.rsqrt(var + 1e-5)
    scale = (gamma * inv).reshape(Cout, 1)
    shift = (beta - mean * gamma * inv).reshape(Cout, 1)

    # ---- pass 2: conv recompute + BN affine + residual add (grid-parallel) ----
    def pass2_kernel(xc_ref, xh_ref, w_ref, y2_ref, sc_ref, sh_ref, o_ref):
        acc = conv_block(xc_ref, xh_ref, w_ref)
        o_ref[...] = acc * sc_ref[...] + sh_ref[...] + y2_ref[...]

    out_flat = pl.pallas_call(
        pass2_kernel,
        out_shape=jax.ShapeDtypeStruct((Cout, Lg), jnp.float32),
        grid=(grid,),
        in_specs=[
            pl.BlockSpec((Cin, TL), lambda i: (0, i)),
            pl.BlockSpec((Cin, hw), lambda i: (0, (i + 1) * hstep)),
            pl.BlockSpec((Cout, 9 * Cin), lambda i: (0, 0)),
            pl.BlockSpec((Cout, TL), lambda i: (0, i)),
            pl.BlockSpec((Cout, 1), lambda i: (0, 0)),
            pl.BlockSpec((Cout, 1), lambda i: (0, 0)),
        ],
        out_specs=pl.BlockSpec((Cout, TL), lambda i: (0, i)),
        compiler_params=pltpu.CompilerParams(
            dimension_semantics=("parallel",),
            vmem_limit_bytes=_vmem_limit(
                [(Cin, TL), (Cin, hw), (Cout, 9 * Cin), (Cout, TL),
                 (Cout, 1), (Cout, 1), (Cout, TL)])),
    )(X, X, w2, y2, scale, shift)

    out = out_flat[:, :L].reshape(Cout, N, Hp, Wp)[:, :, 1:H + 1, 1:W + 1]
    return jnp.transpose(out, (1, 0, 2, 3))                            # NCHW


# ------------------------- elementwise add (equal channels) ------------------

def _add_kernel(a_ref, b_ref, o_ref):
    o_ref[...] = a_ref[...] + b_ref[...]


def _pick_row_block(rows, lane):
    """Largest legal row block (within the VMEM budget) that tiles `rows`."""
    max_rows = max(_ADD_MAX_BLOCK_ELEMS // lane, 8)
    if rows <= max_rows:
        return rows                      # single block (block dim == array dim)
    for br in (512, 256, 128, 64, 32, 16, 8):
        if br <= max_rows and rows % br == 0:
            return br
    return None


def _tiled_add(a2, b2, br, lane):
    rows = a2.shape[0]
    return pl.pallas_call(
        _add_kernel,
        out_shape=jax.ShapeDtypeStruct((rows, lane), a2.dtype),
        grid=(rows // br,),
        in_specs=[pl.BlockSpec((br, lane), lambda i: (i, 0)),
                  pl.BlockSpec((br, lane), lambda i: (i, 0))],
        out_specs=pl.BlockSpec((br, lane), lambda i: (i, 0)),
        compiler_params=pltpu.CompilerParams(
            dimension_semantics=("parallel",),
            vmem_limit_bytes=_vmem_limit([(br, lane)] * 3)),
    )(a2, b2)


def _elementwise_add(a, b):
    shape = a.shape
    total = int(a.size)
    # fast path: lane-dense factorization with no padding copy (reshape is free)
    for lane in (4096, 2048, 1024, 512, 256, 128):
        if total % lane == 0:
            rows = total // lane
            br = _pick_row_block(rows, lane)
            if br is not None:
                out = _tiled_add(a.reshape(rows, lane), b.reshape(rows, lane),
                                 br, lane)
                return out.reshape(shape)
    # fallback: pad the flat vector up to a tileable lane-dense slab
    lane = 512
    rows = _round_up(-(-total // lane), 8)
    pad = rows * lane - total
    a2 = jnp.pad(a.reshape(-1), (0, pad)).reshape(rows, lane)
    b2 = jnp.pad(b.reshape(-1), (0, pad)).reshape(rows, lane)
    br = _pick_row_block(rows, lane)
    out = _tiled_add(a2, b2, br, lane)
    return out.reshape(-1)[:total].reshape(shape)


# ----------------------------------- forward ---------------------------------

def sum_forward(inputs1, inputs2, channels, params):
    """Pallas-backed equivalent of Sum.forward (NCHW in, NCHW out)."""
    x1, x2 = _torch_like_pad(inputs1, inputs2)
    if channels[0] != channels[1]:
        # conv bias params["b"] is a mathematical no-op through training-mode BN,
        # so the kernel omits it (the reference keeps it to prove equivalence).
        return _conv_bn_add(x1, x2, params["w"], params["gamma"], params["beta"])
    return _elementwise_add(x1, x2)


# ----------------------------- pure-JAX reference ----------------------------

def ref_sum_forward(inputs1, inputs2, channels, params):
    x1, x2 = _torch_like_pad(inputs1, inputs2)
    if channels[0] != channels[1]:
        y = jax.lax.conv_general_dilated(
            x1, params["w"], window_strides=(1, 1), padding=((1, 1), (1, 1)),
            dimension_numbers=("NCHW", "OIHW", "NCHW"),
        ) + params["b"][None, :, None, None]
        mean = y.mean(axis=(0, 2, 3), keepdims=True)
        var = ((y - mean) ** 2).mean(axis=(0, 2, 3), keepdims=True)
        x1 = ((y - mean) * jax.lax.rsqrt(var + 1e-5)
              * params["gamma"][None, :, None, None]
              + params["beta"][None, :, None, None])
    return x1 + x2


# ----------------------------------- main -------------------------------------

if __name__ == "__main__":
    key = jax.random.PRNGKey(0)
    k1, k2, k3, k4 = jax.random.split(key, 4)

    # Case 1: channels[0] != channels[1] -> Conv2d + BatchNorm2d branch.
    channels = (4, 8)
    N = 2
    inputs1 = jax.random.normal(k1, (N, channels[0], 14, 14), jnp.float32)
    inputs2 = jax.random.normal(k2, (N, channels[1], 16, 16), jnp.float32)

    fan_in = channels[0] * 3 * 3
    bound = 1.0 / math.sqrt(fan_in)
    params = {
        "w": jax.random.uniform(k3, (channels[1], channels[0], 3, 3),
                                jnp.float32, -bound, bound),
        "b": jax.random.uniform(k4, (channels[1],), jnp.float32, -bound, bound),
        "gamma": jnp.ones((channels[1],), jnp.float32),   # BN weight default
        "beta": jnp.zeros((channels[1],), jnp.float32),   # BN bias default
    }

    out = sum_forward(inputs1, inputs2, channels, params)
    jax.block_until_ready(out)
    assert out.shape == (N, channels[1], 16, 16)
    ref = ref_sum_forward(inputs1, inputs2, channels, params)
    err = float(jnp.max(jnp.abs(out - ref)))
    assert jnp.allclose(out, ref, atol=1e-3, rtol=1e-3), err

    # Case 2: larger spatial size -> exercises multi-block grid, the 128-lane
    # halo and the cross-image validity mask.
    x1b = jax.random.normal(k1, (N, channels[0], 40, 40), jnp.float32)
    x2b = jax.random.normal(k2, (N, channels[1], 40, 40), jnp.float32)
    outb = sum_forward(x1b, x2b, channels, params)
    jax.block_until_ready(outb)
    refb = ref_sum_forward(x1b, x2b, channels, params)
    errb = float(jnp.max(jnp.abs(outb - refb)))
    assert outb.shape == (N, channels[1], 40, 40)
    assert jnp.allclose(outb, refb, atol=1e-3, rtol=1e-3), errb

    # Case 3: channels[0] == channels[1] -> plain padded elementwise-add branch.
    channels_eq = (4, 4)
    y1 = jax.random.normal(k1, (N, 4, 16, 16), jnp.float32)
    y2 = jax.random.normal(k2, (N, 4, 13, 13), jnp.float32)
    out2 = sum_forward(y1, y2, channels_eq, params)
    jax.block_until_ready(out2)
    ref2 = ref_sum_forward(y1, y2, channels_eq, params)
    assert out2.shape == (N, 4, 16, 16)
    assert jnp.allclose(out2, ref2, atol=1e-5, rtol=1e-5)

    print("KERNEL_OK")
</pallas_src>

<mosaic_0001>
module attributes {stable_mosaic.version = 11 : i64} {
  func.func @pass1_kernel(%arg0: i32, %arg1: memref<4x768xf32, #tpu.memory_space<vmem>>, %arg2: memref<4x128xf32, #tpu.memory_space<vmem>>, %arg3: memref<8x36xf32, #tpu.memory_space<vmem>>, %arg4: memref<1x8x128xf32, #tpu.memory_space<vmem>>) attributes {dimension_semantics = [#tpu.dimension_semantics<parallel>], iteration_bounds = array<i64: 1>, scalar_prefetch = 0 : i64, scratch_operands = 0 : i64, tpu.core_type = #tpu.core_type<tc>, window_params = [{transform_indices = @transform_0, window_bounds = array<i64: 4, 768>}, {transform_indices = @transform_1, window_bounds = array<i64: 4, 128>}, {pipeline_mode = #tpu.pipeline_mode<synchronous>, transform_indices = @transform_2, window_bounds = array<i64: 8, 36>}, {transform_indices = @transform_3, window_bounds = array<i64: 1, 8, 128>}]} {
    %c0 = arith.constant 0 : index
    %c0_0 = arith.constant 0 : index
    %0 = vector.load %arg1[%c0, %c0_0] : memref<4x768xf32, #tpu.memory_space<vmem>>, vector<4x768xf32>
    %c0_1 = arith.constant 0 : index
    %c0_2 = arith.constant 0 : index
    %1 = vector.load %arg2[%c0_1, %c0_2] : memref<4x128xf32, #tpu.memory_space<vmem>>, vector<4x128xf32>
    %2 = tpu.concatenate %0, %1 in 1 : vector<4x768xf32>, vector<4x128xf32> -> vector<4x896xf32>
    %3 = vector.extract_strided_slice %2 {offsets = [0, 0], sizes = [4, 768], strides = [1, 1]} : vector<4x896xf32> to vector<4x768xf32>
    %4 = vector.extract_strided_slice %2 {offsets = [0, 1], sizes = [4, 768], strides = [1, 1]} : vector<4x896xf32> to vector<4x768xf32>
    %5 = vector.extract_strided_slice %2 {offsets = [0, 2], sizes = [4, 768], strides = [1, 1]} : vector<4x896xf32> to vector<4x768xf32>
    %6 = vector.extract_strided_slice %2 {offsets = [0, 18], sizes = [4, 768], strides = [1, 1]} : vector<4x896xf32> to vector<4x768xf32>
    %7 = vector.extract_strided_slice %2 {offsets = [0, 19], sizes = [4, 768], strides = [1, 1]} : vector<4x896xf32> to vector<4x768xf32>
    %8 = vector.extract_strided_slice %2 {offsets = [0, 20], sizes = [4, 768], strides = [1, 1]} : vector<4x896xf32> to vector<4x768xf32>
    %9 = vector.extract_strided_slice %2 {offsets = [0, 36], sizes = [4, 768], strides = [1, 1]} : vector<4x896xf32> to vector<4x768xf32>
    %10 = vector.extract_strided_slice %2 {offsets = [0, 37], sizes = [4, 768], strides = [1, 1]} : vector<4x896xf32> to vector<4x768xf32>
    %11 = vector.extract_strided_slice %2 {offsets = [0, 38], sizes = [4, 768], strides = [1, 1]} : vector<4x896xf32> to vector<4x768xf32>
    %12 = tpu.concatenate %3, %4, %5, %6, %7, %8, %9, %10, %11 in 0 : vector<4x768xf32>, vector<4x768xf32>, vector<4x768xf32>, vector<4x768xf32>, vector<4x768xf32>, vector<4x768xf32>, vector<4x768xf32>, vector<4x768xf32>, vector<4x768xf32> -> vector<36x768xf32>
    %c0_3 = arith.constant 0 : index
    %c0_4 = arith.constant 0 : index
    %13 = vector.load %arg3[%c0_3, %c0_4] : memref<8x36xf32, #tpu.memory_space<vmem>>, vector<8x36xf32>
    %cst = arith.constant dense<0.000000e+00> : vector<8x768xf32>
    %14 = tpu.matmul %13, %12, %cst {dimension_numbers = #tpu.dot_dimension_numbers<[1], [0], [0], [1], [0, 0, 1, 1], [], []>} : vector<8x36xf32>, vector<36x768xf32>, vector<8x768xf32> -> vector<8x768xf32>
    %c768_i32 = arith.constant 768 : i32
    %15 = arith.muli %arg0, %c768_i32 : i32
    %16 = arith.sitofp %15 : i32 to f32
    %17 = tpu.iota {dimensions = array<i32: 1>} : vector<1x768xi32>
    %18 = arith.sitofp %17 : vector<1x768xi32> to vector<1x768xf32>
    %19 = vector.broadcast %16 : f32 to vector<1x768xf32>
    %20 = arith.addf %18, %19 : vector<1x768xf32>
    %cst_5 = arith.constant 3.240000e+02 : f32
    %21 = vector.broadcast %cst_5 : f32 to vector<1x768xf32>
    %22 = arith.divf %20, %21 : vector<1x768xf32>
    %23 = math.floor %22 : vector<1x768xf32>
    %cst_6 = arith.constant 3.240000e+02 : f32
    %24 = vector.broadcast %cst_6 : f32 to vector<1x768xf32>
    %25 = arith.mulf %23, %24 : vector<1x768xf32>
    %26 = arith.subf %20, %25 : vector<1x768xf32>
    %cst_7 = arith.constant 1.800000e+01 : f32
    %27 = vector.broadcast %cst_7 : f32 to vector<1x768xf32>
    %28 = arith.divf %26, %27 : vector<1x768xf32>
    %29 = math.floor %28 : vector<1x768xf32>
    %cst_8 = arith.constant 1.800000e+01 : f32
    %30 = vector.broadcast %cst_8 : f32 to vector<1x768xf32>
    %31 = arith.mulf %29, %30 : vector<1x768xf32>
    %32 = arith.subf %26, %31 : vector<1x768xf32>
    %cst_9 = arith.constant 6.480000e+02 : f32
    %33 = vector.broadcast %cst_9 : f32 to vector<1x768xf32>
    %34 = arith.cmpf olt, %20, %33 : vector<1x768xf32>
    %cst_10 = arith.constant 1.000000e+00 : f32
    %35 = vector.broadcast %cst_10 : f32 to vector<1x768xf32>
    %36 = arith.cmpf oge, %32, %35 : vector<1x768xf32>
    %37 = arith.andi %34, %36 : vector<1x768xi1>
    %cst_11 = arith.constant 1.600000e+01 : f32
    %38 = vector.broadcast %cst_11 : f32 to vector<1x768xf32>
    %39 = arith.cmpf ole, %32, %38 : vector<1x768xf32>
    %40 = arith.andi %37, %39 : vector<1x768xi1>
    %cst_12 = arith.constant 1.000000e+00 : f32
    %41 = vector.broadcast %cst_12 : f32 to vector<1x768xf32>
    %42 = arith.cmpf oge, %29, %41 : vector<1x768xf32>
    %43 = arith.andi %40, %42 : vector<1x768xi1>
    %cst_13 = arith.constant 1.600000e+01 : f32
    %44 = vector.broadcast %cst_13 : f32 to vector<1x768xf32>
    %45 = arith.cmpf ole, %29, %44 : vector<1x768xf32>
    %46 = arith.andi %43, %45 : vector<1x768xi1>
    %47 = arith.extui %46 : vector<1x768xi1> to vector<1x768xi32>
    %48 = arith.sitofp %47 : vector<1x768xi32> to vector<1x768xf32>
    %49 = vector.broadcast %48 : vector<1x768xf32> to vector<8x768xf32>
    %50 = arith.mulf %14, %49 : vector<8x768xf32>
    %cst_14 = arith.constant dense<0.000000e+00> : vector<8xf32>
    %51 = vector.multi_reduction <add>, %50, %cst_14 [1] : vector<8x768xf32> to vector<8xf32>
    %52 = vector.shape_cast %51 : vector<8xf32> to vector<8x1xf32>
    %53 = arith.mulf %14, %50 : vector<8x768xf32>
    %cst_15 = arith.constant dense<0.000000e+00> : vector<8xf32>
    %54 = vector.multi_reduction <add>, %53, %cst_15 [1] : vector<8x768xf32> to vector<8xf32>
    %55 = vector.shape_cast %54 : vector<8xf32> to vector<8x1xf32>
    %56 = tpu.iota {dimensions = array<i32: 1>} : vector<8x128xi32>
    %c0_i32 = arith.constant 0 : i32
    %57 = vector.broadcast %c0_i32 : i32 to vector<8x128xi32>
    %58 = arith.cmpi eq, %56, %57 : vector<8x128xi32>
    %cst_16 = arith.constant 0.000000e+00 : f32
    %59 = vector.shape_cast %52 : vector<8x1xf32> to vector<8x1xf32>
    %60 = vector.broadcast %59 : vector<8x1xf32> to vector<8x128xf32>
    %61 = vector.broadcast %cst_16 : f32 to vector<8x128xf32>
    %62 = arith.select %58, %60, %61 : vector<8x128xi1>, vector<8x128xf32>
    %c1_i32 = arith.constant 1 : i32
    %63 = vector.broadcast %c1_i32 : i32 to vector<8x128xi32>
    %64 = arith.cmpi eq, %56, %63 : vector<8x128xi32>
    %cst_17 = arith.constant 0.000000e+00 : f32
    %65 = vector.shape_cast %55 : vector<8x1xf32> to vector<8x1xf32>
    %66 = vector.broadcast %65 : vector<8x1xf32> to vector<8x128xf32>
    %67 = vector.broadcast %cst_17 : f32 to vector<8x128xf32>
    %68 = arith.select %64, %66, %67 : vector<8x128xi1>, vector<8x128xf32>
    %69 = arith.addf %62, %68 : vector<8x128xf32>
    %c0_18 = arith.constant 0 : index
    %c0_19 = arith.constant 0 : index
    %c0_20 = arith.constant 0 : index
    %70 = vector.load %arg4[%c0_18, %c0_19, %c0_20] : memref<1x8x128xf32, #tpu.memory_space<vmem>>, vector<1x8x128xf32>
    %71 = vector.shape_cast %70 : vector<1x8x128xf32> to vector<8x128xf32>
    %72 = vector.shape_cast %69 : vector<8x128xf32> to vector<1x8x128xf32>
    tpu.vector_store %arg4[%c0_18, %c0_19, %c0_20], %72 {strides = array<i32>} : memref<1x8x128xf32, #tpu.memory_space<vmem>>, vector<1x8x128xf32>,
    return
  }
  func.func @transform_0(%arg0: i32) -> (i32, i32) {
    %c0_i32 = arith.constant 0 : i32
    %c0_i32_0 = arith.constant 0 : i32
    return %c0_i32, %arg0 : i32, i32
  }
  func.func @transform_1(%arg0: i32) -> (i32, i32) {
    %c1_i32 = arith.constant 1 : i32
    %0 = arith.addi %arg0, %c1_i32 : i32
    %c6_i32 = arith.constant 6 : i32
    %1 = arith.muli %0, %c6_i32 : i32
    %c0_i32 = arith.constant 0 : i32
    %c0_i32_0 = arith.constant 0 : i32
    return %c0_i32, %1 : i32, i32
  }
  func.func @transform_2(%arg0: i32) -> (i32, i32) {
    %c0_i32 = arith.constant 0 : i32
    %c0_i32_0 = arith.constant 0 : i32
    %c0_i32_1 = arith.constant 0 : i32
    return %c0_i32, %c0_i32_0 : i32, i32
  }
  func.func @transform_3(%arg0: i32) -> (i32, i32, i32) {
    %c0_i32 = arith.constant 0 : i32
    %c0_i32_0 = arith.constant 0 : i32
    %c0_i32_1 = arith.constant 0 : i32
    return %arg0, %c0_i32, %c0_i32_0 : i32, i32, i32
  }
}

</mosaic_0001>

<bundles_post_ra>
// kernel: tpu_custom_call.1
= control target key start
LH: loop header
LB: loop body
LE: loop exit
PB: predicated region body
PF: predicated region fallthrough
CT: control target
= control target key end

     0   :  { %8 = vsyncpa [#allocation3], 0  ;;  %s1372_s0 = inlined_call_operand.hbm [shape: f32[4,896], index: 0, kind: input, shape index: {}]   ;;  %s1373_s1 = inlined_call_operand.hbm [shape: f32[4,896], index: 1, kind: input, shape index: {}]   ;;  %s1374_s2 = inlined_call_operand.hbm [shape: f32[8,36], index: 2, kind: input, shape index: {}]   ;;  %s1375_s3 = inlined_call_operand.hbm [shape: f32[1,8,128], index: 3, kind: output, shape index: {}]  }
   0x1   :  { %9 = vsyncpa [#allocation6], 0  ;;  %s728_s14 = scalar_lea.hbm %s1373_s1, 384 }
   0x2   :  { %10 = vsyncpa [#allocation4], 0  ;;  %s986_s15 = smov [#allocation5]   ;;  %s987_s17 = smov [#allocation2]  }
   0x3   :  { %s31_s16 = sshll.u32 %s986_s15, 4  ;;  %s17_s18 = sshll.u32 %s987_s17, 4  ;;  %s32_s16 = int_to_ptr.vmem [resolvable:$true] %s31_s16  ;;  %s18_s18 = int_to_ptr.vmem [resolvable:$true] %s17_s18 }
   0x4   :  { %s913_s21 = scalar_lea.hbm %s1373_s1, 448  ;;  %p892_p1 = scmp.lt.u32.totalorder %s728_s14, %s1373_s1 }
   0x5   :  { %p890_p0 = scmp.ne.s32.totalorder %s728_s14, %s913_s21  ;;  %p893_p2 = scmp.lt.u32.totalorder %s913_s21, %s913_s21 }
   0x6   :  { %p895_p4 = scmp.lt.u32.totalorder %s913_s21, %s728_s14 }
   0x7   :  { %p894_p3 = por %p893_p2, %p892_p1 }
   0x9   :  { %p896_p5 = por %p895_p4, %p894_p3 }
   0xb   :  { %p897_p6 = pnand %p896_p5, %p890_p0 }
   0xd   :  { %900 = shalt.err (!%p897_p6)
}
   0xe   :  { %s901_s24 = scalar_lea.vmem %s32_s16, 64  ;;  %p906_p8 = scmp.lt.s32.totalorder %s32_s16, %s32_s16 }
   0xf   :  { %p902_p7 = scmp.ne.s32.totalorder %s32_s16, %s901_s24  ;;  %p907_p9 = scmp.lt.s32.totalorder %s901_s24, %s901_s24 }
  0x11   :  { %p908_p10 = por %p907_p9, %p906_p8 }
  0x13   :  { %p909_p11 = pnand %p908_p10, %p902_p7 }
  0x15   :  { %912 = shalt.err (!%p909_p11)
}
  0x16   :  { %34 = dma.hbm_to_vmem [thread:$0]  %s728_s14, 64, %s32_s16, [#allocation6]  }
  0x17   :  { %s914_s27 = scalar_lea.hbm %s1372_s0, 384  ;;  %s916_s4 = scalar_lea.hbm %s1372_s0, 448 }
  0x18   :  { %p915_p12 = scmp.ne.s32.totalorder %s1372_s0, %s914_s27  ;;  %p917_p13 = scmp.lt.u32.totalorder %s916_s4, %s914_s27 }
  0x19   :  { %p918_p0 = scmp.lt.u32.totalorder %s914_s27, %s1372_s0 }
  0x1b   :  { %p919_p1 = por %p918_p0, %p917_p13 }
  0x1d   :  { %p920_p2 = pnand %p919_p1, %p915_p12 }
  0x1f   :  { %923 = shalt.err (!%p920_p2)
}
  0x20   :  { %s924_s7 = scalar_lea.vmem %s18_s18, 384  ;;  %p929_p4 = scmp.lt.s32.totalorder %s18_s18, %s18_s18 }
  0x21   :  { %p925_p3 = scmp.ne.s32.totalorder %s18_s18, %s924_s7  ;;  %p930_p5 = scmp.lt.s32.totalorder %s924_s7, %s924_s7 }
  0x23   :  { %p931_p6 = por %p930_p5, %p929_p4 }
  0x25   :  { %p932_p7 = pnand %p931_p6, %p925_p3 }
  0x27   :  { %935 = shalt.err (!%p932_p7)
}
  0x28   :  { %20 = dma.hbm_to_vmem [thread:$0]  %s1372_s0, 384, %s18_s18, [#allocation3]  }
  0x29   :  { %s988_s10 = smov [#allocation7]   ;;  %s936_s14 = scalar_lea.hbm %s1374_s2, 128 }
  0x2a   :  { %s41_s11 = sshll.u32 %s988_s10, 4  ;;  %p937_p8 = scmp.ne.s32.totalorder %s1374_s2, %s936_s14  ;;  %s42_s11 = int_to_ptr.vmem [resolvable:$true] %s41_s11 }
  0x2b   :  { %p940_p9 = scmp.lt.u32.totalorder %s936_s14, %s1374_s2 }
  0x2d   :  { %p942_p10 = pnand %p940_p9, %p937_p8 }
  0x2f   :  { %945 = shalt.err (!%p942_p10)
}
  0x30   :  { %s946_s20 = scalar_lea.vmem %s42_s11, 128  ;;  %p951_p12 = scmp.lt.s32.totalorder %s42_s11, %s42_s11 }
  0x31   :  { %p947_p11 = scmp.ne.s32.totalorder %s42_s11, %s946_s20  ;;  %p952_p13 = scmp.lt.s32.totalorder %s946_s20, %s946_s20 }
  0x33   :  { %p953_p0 = por %p952_p13, %p951_p12 }
  0x35   :  { %p954_p1 = pnand %p953_p0, %p947_p11 }
  0x37   :  { %957 = shalt.err (!%p954_p1)
}
  0x38   :  { %44 = dma.hbm_to_vmem [thread:$0]  %s1374_s2, 128, %s42_s11, [#allocation6]  }
  0x39   :  { %980 = dma.done.wait [#allocation3], 384  }
  0x3a   :  { %981 = vsyncadd [#allocation3], 4294966912 }
  0x3b   :  { %982 = dma.done.wait [#allocation6], 192  }
  0x3c   :  { %983 = vsyncadd [#allocation6], 4294967104  ;;  %v1055_v0 = vld [vmem:[#allocation2] sm:$0xff]  ;;  %v1057_v1 = vld [vmem:[#allocation2 + $0x8] sm:$0xff]  ;;  %s989_s2 = smov 110   ;;  %s990_s21 = smov 127  }
  0x3d   :  { %v1061_v2 = vcombine.high %v1055_v0, %v1055_v0  ;;  %v1065_v3 = vcombine.high %v1057_v1, %v1057_v1  ;;  %v72_v4 = vrot.slane %v1057_v1, 4  ;;  %v70_v5 = vrot.slane %v1055_v0, 4  ;;  %s991_s22 = smov 126   ;;  %s992_s23 = smov 108   ;;  %v1083_v10 = vld [vmem:[#allocation2 + $0x10] sm:$0xff] }
  0x3e   :  { %s993_s24 = smov 109   ;;  %s994_s25 = smov 91   ;;  %v1089_v11 = vcombine.high %v1083_v10, %v1083_v10  ;;  %v74_v12 = vrot.slane %v1083_v10, 4  ;;  %v59_v15 = vld [vmem:[#allocation5] sm:$0xf]  ;;  %v996_v17 = vmov 0.0  }
  0x3f   :  { %v791_v6 = vpack.i.bf16 %v72_v4, %v1061_v2  ;;  %v796_v7 = vpack.i.bf16 %v1065_v3, %v70_v5  ;;  %v786_v8 = vpack.i.bf16 %v1057_v1, %v1061_v2  ;;  %v801_v9 = vpack.i.bf16 %v1065_v3, %v1055_v0  ;;  %s995_s26 = smov 92   ;;  %393 = vmatprep.mubr.f32.mxu0 %v996_v17  ;;  %s997_s27 = smov 90  }
  0x40   :  { %v856_v13 = vpack.i.bf16 %v1089_v11, %v1083_v10  ;;  %v851_v14 = vpack.i.bf16 %v1089_v11, %v74_v12  ;;  %v76_v16 = vrot.slane %v59_v15, 4  ;;  %464 = vmatprep.mubr.f32.mxu1 %v996_v17  ;;  %vm145_vm0 = vcmask 900096   ;;  %s998_s1 = smov [#allocation8]  }
  0x41   :  { %792 = vrot.lane.b32.xlu1 %v791_v6, %s989_s2  ;;  %782 = vrot.lane.b32.xlu0 %v791_v6, %s990_s21  ;;  %vm91_vm1 = vcmask 1039360   ;;  %vm118_vm2 = vcmask 1031168   ;;  %vm287_vm3 = vcmask 1043456   ;;  %vm199_vm4 = vcmask 883712   ;;  %s718_s28 = sshll.u32 %s998_s1, 4  ;;  %s719_s28 = int_to_ptr.vmem [resolvable:$true] %s718_s28 }
  0x42   :  { %vm172_vm5 = vcmask 891904   ;;  %vm253_vm6 = vcmask 744448   ;;  %vm226_vm7 = vcmask 752640   ;;  %vm280_vm8 = vcmask 736256   ;;  %s958_s29 = scalar_lea.vmem %s719_s28, 128  ;;  %p963_p3 = scmp.lt.s32.totalorder %s719_s28, %s719_s28 }
  0x43   :  { %vm313_vm9 = vcmask 293888   ;;  %p959_p2 = scmp.ne.s32.totalorder %s719_s28, %s958_s29  ;;  %p964_p4 = scmp.lt.s32.totalorder %s958_s29, %s958_s29 }
  0x45   :  { %797 = vrot.lane.b32.xlu1 %v796_v7, %s990_s21  ;;  %787 = vrot.lane.b32.xlu0 %v786_v8, %s991_s22  ;;  %p965_p5 = por %p964_p4, %p963_p3 }
  0x47   :  { %p966_p6 = pnand %p965_p5, %p959_p2 }
  0x49   :  { %807 = vrot.lane.b32.xlu1 %v796_v7, %s989_s2  ;;  %802 = vrot.lane.b32.xlu0 %v801_v9, %s991_s22 }
  0x4d   :  { %817 = vrot.lane.b32.xlu1 %v791_v6, %s992_s23  ;;  %812 = vrot.lane.b32.xlu0 %v786_v8, %s993_s24 }
  0x51   :  { %827 = vrot.lane.b32.xlu1 %v791_v6, %s994_s25  ;;  %822 = vrot.lane.b32.xlu0 %v786_v8, %s995_s26 }
  0x55   :  { %837 = vrot.lane.b32.xlu1 %v796_v7, %s992_s23  ;;  %832 = vrot.lane.b32.xlu0 %v801_v9, %s993_s24 }
  0x59   :  { %847 = vrot.lane.b32.xlu1 %v796_v7, %s994_s25  ;;  %842 = vrot.lane.b32.xlu0 %v801_v9, %s995_s26 }
  0x5d   :  { %857 = vrot.lane.b32.xlu1 %v856_v13, %s991_s22  ;;  %852 = vrot.lane.b32.xlu0 %v851_v14, %s990_s21 }
  0x61   :  { %89 = vrot.lane.b32.xlu1 %v76_v16, %s990_s21  ;;  %862 = vrot.lane.b32.xlu0 %v851_v14, %s989_s2 }
  0x65   :  { %143 = vrot.lane.b32.xlu1 %v76_v16, %s989_s2  ;;  %116 = vrot.lane.b32.xlu0 %v59_v15, %s991_s22 }
  0x69   :  { %872 = vrot.lane.b32.xlu1 %v851_v14, %s992_s23  ;;  %867 = vrot.lane.b32.xlu0 %v856_v13, %s993_s24 }
  0x6d   :  { %882 = vrot.lane.b32.xlu1 %v851_v14, %s994_s25  ;;  %877 = vrot.lane.b32.xlu0 %v856_v13, %s995_s26 }
  0x71   :  { %270 = vrot.lane.b32.xlu1 %v1057_v1, %s997_s27  ;;  %268 = vrot.lane.b32.xlu0 %v1061_v2, %s997_s27 }
  0x75   :  { %170 = vrot.lane.b32.xlu1 %v59_v15, %s993_s24  ;;  %266 = vrot.lane.b32.xlu0 %v1055_v0, %s997_s27 }
  0x79   :  { %224 = vrot.lane.b32.xlu1 %v59_v15, %s995_s26  ;;  %197 = vrot.lane.b32.xlu0 %v76_v16, %s992_s23 }
  0x7d   :  { %272 = vrot.lane.b32.xlu1 %v1065_v3, %s997_s27  ;;  %251 = vrot.lane.b32.xlu0 %v76_v16, %s994_s25 }
  0x81   :  { %276 = vrot.lane.b32.xlu1 %v1089_v11, %s997_s27  ;;  %274 = vrot.lane.b32.xlu0 %v1083_v10, %s997_s27 }
  0x85   :  { %278 = vrot.lane.b32.xlu0 %v59_v15, %s997_s27 }
  0xb3   :  { %v1117_v18 = vpop.permute.xlu1 %792  ;;  %v1119_v19 = vpop.permute.xlu0 %782 }
  0xb4   :  { %v795_v20 = vunpack.i.h.bf16 %v1117_v18  ;;  %v794_v21 = vunpack.i.l.bf16 %v1117_v18  ;;  %v785_v22 = vunpack.i.h.bf16 %v1119_v19  ;;  %v784_v23 = vunpack.i.l.bf16 %v1119_v19 }
  0xb6   :  { %v147_v28 = vsel %vm145_vm0, %v794_v21, %v795_v20  ;;  %v93_v30 = vsel %vm91_vm1, %v784_v23, %v785_v22 }
  0xb7   :  { %v1125_v24 = vpop.permute.xlu1 %797  ;;  %v1127_v25 = vpop.permute.xlu0 %787  ;;  %v289_v37 = vsel %vm287_vm3, %v1061_v2, %v93_v30 }
  0xb8   :  { %v790_v26 = vunpack.i.h.bf16 %v1127_v25  ;;  %v789_v27 = vunpack.i.l.bf16 %v1127_v25  ;;  %v799_v29 = vunpack.i.l.bf16 %v1125_v24 }
  0xba   :  { %v120_v31 = vsel %vm118_vm2, %v789_v27, %v790_v26  ;;  %v92_v39 = vsel %vm91_vm1, %v799_v29, %v784_v23 }
  0xbb   :  { %v1141_v32 = vpop.permute.xlu1 %807  ;;  %v1143_v33 = vpop.permute.xlu0 %802  ;;  %v295_v34 = vsel %vm287_vm3, %v120_v31, %v147_v28  ;;  %v288_v46 = vsel %vm287_vm3, %v1055_v0, %v92_v39  ;;  %v800_v31 = vunpack.i.h.bf16 %v1125_v24 }
  0xbc   :  { %v809_v35 = vunpack.i.l.bf16 %v1141_v32  ;;  %v804_v36 = vunpack.i.l.bf16 %v1143_v33  ;;  %v744_v38 = vpack.c.bf16 %v295_v34, %v289_v37  ;;  %v810_v16 = vunpack.i.h.bf16 %v1141_v32 }
  0xbd   :  { %v94_v24 = vsel %vm91_vm1, %v785_v22, %v800_v31 }
  0xbe   :  { %v119_v40 = vsel %vm118_vm2, %v804_v36, %v789_v27  ;;  %v146_v41 = vsel %vm145_vm0, %v809_v35, %v794_v21  ;;  %745 = vmatprep.subr.bf16.mxu0 %v744_v38  ;;  %v805_v21 = vunpack.i.h.bf16 %v1143_v33  ;;  %v148_v33 = vsel %vm145_vm0, %v795_v20, %v810_v16 }
  0xbf   :  { %v1153_v42 = vpop.permute.xlu1 %817  ;;  %v1155_v43 = vpop.permute.xlu0 %812  ;;  %v294_v44 = vsel %vm287_vm3, %v119_v40, %v146_v41 }
  0xc0   :  { %v820_v45 = vunpack.i.h.bf16 %v1153_v42  ;;  %v819_v47 = vunpack.i.l.bf16 %v1153_v42  ;;  %v815_v48 = vunpack.i.h.bf16 %v1155_v43  ;;  %v814_v49 = vunpack.i.l.bf16 %v1155_v43 }
  0xc1   :  { %v746_v50 = vpack.c.bf16 %v294_v44, %v288_v46  ;;  %v121_v32 = vsel %vm118_vm2, %v790_v26, %v805_v21 }
  0xc2   :  { %v201_v57 = vsel %vm199_vm4, %v819_v47, %v820_v45  ;;  %v174_v58 = vsel %vm172_vm5, %v814_v49, %v815_v48  ;;  %v296_v25 = vsel %vm287_vm3, %v121_v32, %v148_v33 }
  0xc3   :  { %747 = vmatpush1.bf16.msra.mxu0 %v746_v50  ;;  %v1164_v51 = vpop.permute.xlu1 %827  ;;  %v1166_v52 = vpop.permute.xlu0 %822  ;;  %v301_v0 = vsel %vm287_vm3, %v174_v58, %v201_v57 }
  0xc4   :  { %v830_v53 = vunpack.i.h.bf16 %v1164_v51  ;;  %v829_v54 = vunpack.i.l.bf16 %v1164_v51  ;;  %v825_v55 = vunpack.i.h.bf16 %v1166_v52  ;;  %v824_v56 = vunpack.i.l.bf16 %v1166_v52 }
  0xc6   :  { %v255_v59 = vsel %vm253_vm6, %v829_v54, %v830_v53  ;;  %v228_v60 = vsel %vm226_vm7, %v824_v56, %v825_v55 }
  0xc7   :  { %v1182_v61 = vpop.permute.xlu1 %837  ;;  %v1184_v62 = vpop.permute.xlu0 %832  ;;  %v307_v63 = vsel %vm287_vm3, %v228_v60, %v255_v59 }
  0xc8   :  { %v839_v2 = vunpack.i.l.bf16 %v1182_v61  ;;  %v834_v4 = vunpack.i.l.bf16 %v1184_v62  ;;  %v748_v5 = vpack.c.bf16 %v307_v63, %v301_v0  ;;  %v835_v57 = vunpack.i.h.bf16 %v1184_v62 }
  0xca   :  { %749 = vmatprep.subr.bf16.mxu0 %v748_v5  ;;  %v200_v12 = vsel %vm199_vm4, %v839_v2, %v819_v47  ;;  %v173_v13 = vsel %vm172_vm5, %v834_v4, %v814_v49  ;;  %v290_v47 = vsel %vm287_vm3, %v1057_v1, %v94_v24 }
  0xcb   :  { %v1190_v6 = vpop.permute.xlu1 %847  ;;  %v1192_v7 = vpop.permute.xlu0 %842  ;;  %v300_v30 = vsel %vm287_vm3, %v173_v13, %v200_v12  ;;  %v754_v19 = vpack.c.bf16 %v296_v25, %v290_v47 }
  0xcc   :  { %v849_v8 = vunpack.i.l.bf16 %v1190_v6  ;;  %v844_v9 = vunpack.i.l.bf16 %v1192_v7  ;;  %v850_v22 = vunpack.i.h.bf16 %v1190_v6  ;;  %v845_v49 = vunpack.i.h.bf16 %v1192_v7 }
  0xce   :  { %v254_v14 = vsel %vm253_vm6, %v849_v8, %v829_v54  ;;  %v227_v15 = vsel %vm226_vm7, %v844_v9, %v824_v56  ;;  %v840_v56 = vunpack.i.h.bf16 %v1182_v61  ;;  %v256_v1 = vsel %vm253_vm6, %v830_v53, %v850_v22 }
  0xcf   :  { %v858_v23 = vpop.permute.xlu1 %857  ;;  %v1202_v27 = vpop.permute.xlu0 %852  ;;  %v306_v28 = vsel %vm287_vm3, %v227_v15, %v254_v14  ;;  %v229_v58 = vsel %vm226_vm7, %v825_v55, %v845_v49  ;;  %v175_v55 = vsel %vm172_vm5, %v815_v48, %v835_v57 }
  0xd0   :  { %v854_v29 = vunpack.i.l.bf16 %v1202_v27  ;;  %v750_v34 = vpack.c.bf16 %v306_v28, %v300_v30  ;;  %v859_v35 = vunpack.i.l.bf16 %v858_v23  ;;  %v860_v59 = vunpack.i.h.bf16 %v858_v23 }
  0xd1   :  { %v202_v53 = vsel %vm199_vm4, %v820_v45, %v840_v56  ;;  %v855_v4 = vunpack.i.h.bf16 %v1202_v27  ;;  %v308_v5 = vsel %vm287_vm3, %v229_v58, %v256_v1 }
  0xd2   :  { %751 = vmatpush1.bf16.msra.mxu0 %v750_v34  ;;  %v95_v39 = vsel %vm91_vm1, %v800_v31, %v854_v29  ;;  %v122_v40 = vsel %vm118_vm2, %v805_v21, %v859_v35  ;;  %v123_v42 = vsel %vm118_vm2, %v859_v35, %v860_v59  ;;  %v302_v21 = vsel %vm287_vm3, %v175_v55, %v202_v53 }
  0xd3   :  { %v90_v36 = vpop.permute.xlu1 %89  ;;  %v863_v37 = vpop.permute.xlu0 %862  ;;  %v291_v18 = vsel %vm287_vm3, %v1065_v3, %v95_v39  ;;  %v96_v23 = vsel %vm91_vm1, %v854_v29, %v855_v4  ;;  %v758_v30 = vpack.c.bf16 %v308_v5, %v302_v21 }
  0xd4   :  { %v864_v38 = vunpack.i.l.bf16 %v863_v37  ;;  %v865_v60 = vunpack.i.h.bf16 %v863_v37  ;;  %v97_v14 = vsel %vm91_vm1, %v855_v4, %v90_v36  ;;  %v312_v37 = vld [vmem:[#allocation7] sm:$0xff]  ;;  %v292_v29 = vsel %vm287_vm3, %v1083_v10, %v96_v23 }
  0xd5   :  { %v293_v34 = vsel %vm287_vm3, %v1089_v11, %v97_v14 }
  0xd6   :  { %v149_v41 = vsel %vm145_vm0, %v810_v16, %v864_v38  ;;  %v150_v45 = vsel %vm145_vm0, %v864_v38, %v865_v60 }
  0xd7   :  { %v144_v26 = vpop.permute.xlu1 %143  ;;  %v117_v44 = vpop.permute.xlu0 %116  ;;  %v297_v20 = vsel %vm287_vm3, %v122_v40, %v149_v41  ;;  %v298_v31 = vsel %vm287_vm3, %v123_v42, %v150_v45 }
  0xd8   :  { %v752_v46 = vpack.c.bf16 %v297_v20, %v291_v18  ;;  %v151_v6 = vsel %vm145_vm0, %v865_v60, %v144_v26  ;;  %v124_v7 = vsel %vm118_vm2, %v860_v59, %v117_v44  ;;  %v762_v39 = vpack.c.bf16 %v298_v31, %v292_v29 }
  0xd9   :  { %v299_v28 = vsel %vm287_vm3, %v124_v7, %v151_v6 }
  0xda   :  { %753 = vmatprep.subr.bf16.mxu1 %v752_v46  ;;  %v760_v32 = vpack.c.bf16 %v299_v28, %v293_v34 }
  0xdb   :  { %v1230_v50 = vpop.permute.xlu1 %872  ;;  %v1232_v52 = vpop.permute.xlu0 %867  ;;  %755 = vmatpush1.bf16.msra.mxu1 %v754_v19 }
  0xdc   :  { %v874_v54 = vunpack.i.l.bf16 %v1230_v50  ;;  %v869_v3 = vunpack.i.l.bf16 %v1232_v52  ;;  %v875_v11 = vunpack.i.h.bf16 %v1230_v50  ;;  %v870_v24 = vunpack.i.h.bf16 %v1232_v52 }
  0xde   :  { %v203_v2 = vsel %vm199_vm4, %v840_v56, %v874_v54  ;;  %v176_v61 = vsel %vm172_vm5, %v835_v57, %v869_v3  ;;  %v204_v44 = vsel %vm199_vm4, %v874_v54, %v875_v11  ;;  %v177_v18 = vsel %vm172_vm5, %v869_v3, %v870_v24 }
  0xdf   :  { %v1242_v63 = vpop.permute.xlu1 %882  ;;  %v878_v0 = vpop.permute.xlu0 %877  ;;  %v303_v48 = vsel %vm287_vm3, %v176_v61, %v203_v2  ;;  %v304_v54 = vsel %vm287_vm3, %v177_v18, %v204_v44  ;;  %v544_v2 = vlaneseq }
  0xe0   :  { %v884_v51 = vunpack.i.l.bf16 %v1242_v63  ;;  %v879_v62 = vunpack.i.l.bf16 %v878_v0  ;;  %v885_v33 = vunpack.i.h.bf16 %v1242_v63  ;;  %v880_v38 = vunpack.i.h.bf16 %v878_v0 }
  0xe1   :  { %v1313_v61 = vand.u32 127, %v544_v2 }
  0xe2   :  { %v257_v8 = vsel %vm253_vm6, %v850_v22, %v884_v51  ;;  %v230_v9 = vsel %vm226_vm7, %v845_v49, %v879_v62  ;;  %v258_v10 = vsel %vm253_vm6, %v884_v51, %v885_v33  ;;  %v231_v25 = vsel %vm226_vm7, %v879_v62, %v880_v38 }
  0xe3   :  { %v271_v12 = vpop.permute.xlu1 %270  ;;  %v269_v43 = vpop.permute.xlu0 %268  ;;  %v309_v13 = vsel %vm287_vm3, %v230_v9, %v257_v8  ;;  %v310_v49 = vsel %vm287_vm3, %v231_v25, %v258_v10  ;;  %v546_v51 = vadd.s32 128, %v1313_v61  ;;  %v551_v62 = vcvt.s32.f32 %v1313_v61 }
  0xe4   :  { %v282_v15 = vsel %vm280_vm8, %v269_v43, %v271_v12  ;;  %v756_v16 = vpack.c.bf16 %v309_v13, %v303_v48  ;;  %v766_v1 = vpack.c.bf16 %v310_v49, %v304_v54  ;;  %v547_v55 = vadd.s32 256, %v1313_v61 }
  0xe5   :  { %729 = vmatprep.subr.msk.mxu0 %vm287_vm3, %v282_v15  ;;  %v552_v53 = vcvt.s32.f32 %v546_v51  ;;  %v565_v4 = vmul.f32 0.0030864198, %v551_v62  ;;  %v548_v9 = vadd.s32 384, %v1313_v61  ;;  %v549_v48 = vadd.s32 512, %v1313_v61 }
  0xe6   :  { %757 = vmatprep.subr.bf16.mxu1 %v756_v16  ;;  %v1318_v6 = vcvt.s32.f32 %v547_v55  ;;  %v550_v14 = vadd.s32 640, %v1313_v61  ;;  %vm614_vm10 = vcmp.lt.f32.partialorder %v551_v62, 648.0 }
  0xe7   :  { %v171_v35 = vpop.permute.xlu1 %170  ;;  %v267_v36 = vpop.permute.xlu0 %266  ;;  %759 = vmatpush1.bf16.msra.mxu1 %v758_v30  ;;  %v566_v5 = vmul.f32 0.0030864198, %v552_v53  ;;  %v571_v7 = vfloor.f32 %v565_v4  ;;  %v1327_v23 = vcvt.s32.f32 %v549_v48  ;;  %vm615_vm12 = vcmp.lt.f32.partialorder %v552_v53, 648.0 }
  0xe8   :  { %v281_v27 = vsel %vm280_vm8, %v267_v36, %v269_v43  ;;  %v178_v46 = vsel %vm172_vm5, %v870_v24, %v171_v35  ;;  %v567_v42 = vmul.f32 0.0030864198, %v1318_v6  ;;  %v1322_v43 = vcvt.s32.f32 %v548_v9 }
  0xe9   :  { %730 = vmatpush1.msk.msra.mxu0 %vm287_vm3, %v281_v27  ;;  %v572_v8 = vfloor.f32 %v566_v5  ;;  %v577_v45 = vmul.f32 324.0, %v571_v7  ;;  %v1329_v30 = vcvt.s32.f32 %v550_v14  ;;  %v569_v36 = vmul.f32 0.0030864198, %v1327_v23 }
  0xea   :  { %761 = vmatprep.subr.bf16.mxu0 %v760_v32  ;;  %731 = vmatmul.mubr.msk.f32.vlgmr.msra.gmra.mrb[0].mxu0 %vm313_vm9, %v312_v37  ;;  %v573_v13 = vfloor.f32 %v567_v42  ;;  %v568_v21 = vmul.f32 0.0030864198, %v1322_v43 }
  0xeb   :  { %v225_v40 = vpop.permute.xlu1 %224  ;;  %v198_v41 = vpop.permute.xlu0 %197  ;;  %763 = vmatpush1.bf16.msra.mxu0 %v762_v39  ;;  %535 = vmatprep.mubr.f32.mxu0 %v996_v17  ;;  %v583_v15 = vsub.f32 %v551_v62, %v577_v45  ;;  %v570_v27 = vmul.f32 0.0030864198, %v1329_v30 }
  0xec   :  { %v205_v26 = vsel %vm199_vm4, %v875_v11, %v198_v41  ;;  %v232_v47 = vsel %vm226_vm7, %v880_v38, %v225_v40  ;;  %v579_v28 = vmul.f32 324.0, %v573_v13  ;;  %v574_v35 = vfloor.f32 %v568_v21 }
  0xed   :  { %v305_v56 = vsel %vm287_vm3, %v178_v46, %v205_v26  ;;  %v590_v31 = vmul.f32 0.055555556, %v583_v15  ;;  %v575_v38 = vfloor.f32 %v569_v36  ;;  %v576_v11 = vfloor.f32 %v570_v27 }
  0xee   :  { %vm616_vm4 = vcmp.lt.f32.partialorder %v1318_v6, 648.0 }
  0xef   :  { %v252_v20 = vpop.permute.xlu0 %251  ;;  %v273_v19 = vpop.permute.xlu1 %272  ;;  %v596_v32 = vfloor.f32 %v590_v31  ;;  %v581_v10 = vmul.f32 324.0, %v575_v38  ;;  %v582_v26 = vmul.f32 324.0, %v576_v11 }
  0xf0   :  { %v259_v22 = vsel %vm253_vm6, %v885_v33, %v252_v20  ;;  %v283_v58 = vsel %vm280_vm8, %v271_v12, %v273_v19  ;;  %v578_v12 = vmul.f32 324.0, %v572_v8  ;;  %v580_v33 = vmul.f32 324.0, %v574_v35 }
  0xf1   :  { %v311_v50 = vsel %vm287_vm3, %v232_v47, %v259_v22  ;;  %v602_v24 = vmul.f32 18.0, %v596_v32  ;;  %v587_v46 = vsub.f32 %v1327_v23, %v581_v10 }
  0xf2   :  { %v764_v57 = vpack.c.bf16 %v311_v50, %v305_v56  ;;  %v584_v16 = vsub.f32 %v552_v53, %v578_v12  ;;  %v586_v41 = vsub.f32 %v1322_v43, %v580_v33  ;;  %v1376_v53 = vmov 0 }
  0xf3   :  { %v275_v52 = vpop.permute.xlu0 %274  ;;  %v277_v59 = vpop.permute.xlu1 %276  ;;  %v608_v44 = vsub.f32 %v583_v15, %v602_v24  ;;  %v594_v49 = vmul.f32 0.055555556, %v587_v46 }
  0xf4   :  { %v284_v3 = vsel %vm280_vm8, %v273_v19, %v275_v52  ;;  %765 = vmatprep.subr.bf16.mxu0 %v764_v57  ;;  %v285_v0 = vsel %vm280_vm8, %v275_v52, %v277_v59  ;;  %v591_v34 = vmul.f32 0.055555556, %v584_v16  ;;  %v593_v20 = vmul.f32 0.055555556, %v586_v41 }
  0xf5   :  { %732 = vmatprep.subr.msk.mxu1 %vm287_vm3, %v284_v3  ;;  %767 = vmatpush1.bf16.msra.mxu0 %v766_v1  ;;  %v588_v19 = vsub.f32 %v1329_v30, %v582_v26  ;;  %vm620_vm11 = vcmp.ge.f32.partialorder %v608_v44, 1.0  ;;  %vm632_vm15 = vcmp.le.f32.partialorder %v608_v44, 16.0  ;;  %v600_v54 = vfloor.f32 %v594_v49 }
  0xf6   :  { %733 = vmatpush1.msk.msra.mxu1 %vm287_vm3, %v283_v58  ;;  %v597_v29 = vfloor.f32 %v591_v34  ;;  %v1337_v22 = vfloor.f32 %v593_v20  ;;  %vm626_vm14 = vmand %vm614_vm10, %vm620_vm11 }
  0xf7   :  { %v279_v60 = vpop.permute.xlu0 %278  ;;  %734 = vmatmul.mubr.msk.f32.vlgmr.msra.gmra.mrb[0].mxu1 %vm313_vm9, %v312_v37  ;;  %v595_v50 = vmul.f32 0.055555556, %v588_v19  ;;  %vm638_vm2 = vmand %vm626_vm14, %vm632_vm15  ;;  %v606_v3 = vmul.f32 18.0, %v600_v54 }
  0xf8   :  { %v286_v63 = vsel %vm280_vm8, %v277_v59, %v279_v60  ;;  %v603_v40 = vmul.f32 18.0, %v597_v29  ;;  %v605_v57 = vmul.f32 18.0, %v1337_v22  ;;  %vm645_vm7 = vcmp.ge.f32.partialorder %v597_v29, 1.0 }
  0xf9   :  { %735 = vmatprep.subr.msk.mxu0 %vm287_vm3, %v286_v63  ;;  %v601_v52 = vfloor.f32 %v595_v50  ;;  %v612_v59 = vsub.f32 %v587_v46, %v606_v3 }
  0xfa   :  { %736 = vmatpush1.msk.msra.mxu0 %vm287_vm3, %v285_v0  ;;  %v609_v18 = vsub.f32 %v584_v16, %v603_v40  ;;  %vm644_vm3 = vcmp.ge.f32.partialorder %v596_v32, 1.0  ;;  %v611_v1 = vsub.f32 %v586_v41, %v605_v57 }
  0xfb   :  { %737 = vmatmul.mubr.msk.f32.vlgmr.msra.gmra.mrb[2].mxu0 %vm313_vm9, %v312_v37  ;;  %v585_v37 = vsub.f32 %v1318_v6, %v579_v28  ;;  %vm650_vm8 = vmand %vm638_vm2, %vm644_vm3  ;;  %vm656_vm9 = vcmp.le.f32.partialorder %v596_v32, 16.0  ;;  %v607_v58 = vmul.f32 18.0, %v601_v52  ;;  %vm617_vm2 = vcmp.lt.f32.partialorder %v1322_v43, 648.0 }
  0xfc   :  { %vm621_vm13 = vcmp.ge.f32.partialorder %v609_v18, 1.0  ;;  %vm633_vm1 = vcmp.le.f32.partialorder %v609_v18, 16.0  ;;  %vm662_vm14 = vmand %vm650_vm8, %vm656_vm9  ;;  %vm623_vm3 = vcmp.ge.f32.partialorder %v611_v1, 1.0  ;;  %vm618_vm8 = vcmp.lt.f32.partialorder %v1327_v23, 648.0 }
  0xfd   :  { %v592_v39 = vmul.f32 0.055555556, %v585_v37  ;;  %vm627_vm0 = vmand %vm615_vm12, %vm621_vm13  ;;  %vm657_vm13 = vcmp.le.f32.partialorder %v597_v29, 16.0  ;;  %v613_v60 = vsub.f32 %v588_v19, %v607_v58  ;;  %v738_v63 = vsel %vm662_vm14, 1.0, %v996_v17 }
  0xfe   :  { %vm639_vm6 = vmand %vm627_vm0, %vm633_vm1  ;;  %vm624_vm9 = vcmp.ge.f32.partialorder %v612_v59, 1.0  ;;  %vm647_vm14 = vcmp.ge.f32.partialorder %v1337_v22, 1.0 }
  0xff   :  { %v598_v25 = vfloor.f32 %v592_v39  ;;  %vm651_vm12 = vmand %vm639_vm6, %vm645_vm7  ;;  %vm635_vm7 = vcmp.le.f32.partialorder %v611_v1, 16.0 }
 0x100   :  { %vm663_vm1 = vmand %vm651_vm12, %vm657_vm13  ;;  %vm625_vm12 = vcmp.ge.f32.partialorder %v613_v60, 1.0 }
 0x101   :  { %v604_v47 = vmul.f32 18.0, %v598_v25  ;;  %vm646_vm0 = vcmp.ge.f32.partialorder %v598_v25, 1.0  ;;  %v739_v0 = vsel %vm663_vm1, 1.0, %v996_v17  ;;  %vm629_vm6 = vmand %vm617_vm2, %vm623_vm3  ;;  %vm637_vm2 = vcmp.le.f32.partialorder %v613_v60, 16.0 }
 0x102   :  { %vm641_vm13 = vmand %vm629_vm6, %vm635_vm7  ;;  %vm649_vm7 = vcmp.ge.f32.partialorder %v601_v52, 1.0 }
 0x103   :  { %v610_v56 = vsub.f32 %v585_v37, %v604_v47  ;;  %vm653_vm3 = vmand %vm641_vm13, %vm647_vm14  ;;  %vm661_vm13 = vcmp.le.f32.partialorder %v601_v52, 16.0 }
 0x105   :  { %vm622_vm5 = vcmp.ge.f32.partialorder %v610_v56, 1.0  ;;  %vm634_vm11 = vcmp.le.f32.partialorder %v610_v56, 16.0 }
 0x106   :  { %vm628_vm10 = vmand %vm616_vm4, %vm622_vm5  ;;  %vm658_vm5 = vcmp.le.f32.partialorder %v598_v25, 16.0 }
 0x107   :  { %vm640_vm15 = vmand %vm628_vm10, %vm634_vm11  ;;  %vm619_vm11 = vcmp.lt.f32.partialorder %v1329_v30, 648.0 }
 0x108   :  { %vm652_vm4 = vmand %vm640_vm15, %vm646_vm0  ;;  %vm636_vm0 = vcmp.le.f32.partialorder %v612_v59, 16.0 }
 0x109   :  { %vm1345_vm10 = vmand %vm652_vm4, %vm658_vm5  ;;  %vm659_vm4 = vcmp.le.f32.partialorder %v1337_v22, 16.0 }
 0x10a   :  { %v1377_v53 = vsel %vm1345_vm10, 4294967295, %v1376_v53  ;;  %vm630_vm15 = vmand %vm618_vm8, %vm624_vm9  ;;  %vm648_vm10 = vcmp.ge.f32.partialorder %v600_v54, 1.0 }
 0x10b   :  { %vm631_vm1 = vmand %vm619_vm11, %vm625_vm12  ;;  %vm660_vm11 = vcmp.le.f32.partialorder %v600_v54, 16.0  ;;  %vm1378_vm14 = vnez %v1377_v53 }
 0x10c   :  { %vm642_vm5 = vmand %vm630_vm15, %vm636_vm0  ;;  %v740_v8 = vsel %vm1378_vm14, 1.0, %v996_v17 }
 0x10d   :  { %vm643_vm6 = vmand %vm631_vm1, %vm637_vm2  ;;  %vm708_vm1 = vcmp.eq.s32.totalorder %v1313_v61, 1 }
 0x10e   :  { %vm665_vm8 = vmand %vm653_vm3, %vm659_vm4 }
 0x10f   :  { %vm654_vm9 = vmand %vm642_vm5, %vm648_vm10  ;;  %v741_v9 = vsel %vm665_vm8, 1.0, %v996_v17  ;;  %vm706_vm10 = vcmp.eq.s32.totalorder %v1313_v61, 0 }
 0x110   :  { %vm655_vm12 = vmand %vm643_vm6, %vm649_vm7 }
 0x111   :  { %vm666_vm0 = vmand %vm654_vm9, %vm660_vm11 }
 0x112   :  { %vm667_vm15 = vmand %vm655_vm12, %vm661_vm13  ;;  %v742_v48 = vsel %vm666_vm0, 1.0, %v996_v17 }
 0x113   :  { %v743_v15 = vsel %vm667_vm15, 1.0, %v996_v17 }
 0x1bd   :  { %v395_v2 = vpop.f32.mrb[0].mxu0 }
 0x1be   :  { %v680_v51 = vmul.f32 %v738_v63, %v395_v2  ;;  %v397_v62 = vpop.f32.mrb[1].mxu0 }
 0x1bf   :  { %v681_v55 = vmul.f32 %v739_v0, %v397_v62 }
 0x1c0   :  { %v693_v4 = vmul.f32 %v680_v51, %v395_v2 }
 0x1c1   :  { %v686_v5 = vadd.f32 %v681_v55, %v680_v51  ;;  %v694_v6 = vmul.f32 %v681_v55, %v397_v62 }
 0x1c3   :  { %v699_v7 = vadd.f32 %v694_v6, %v693_v4 }
 0x1ca   :  { %v466_v42 = vpop.f32.mrb[0].mxu1 }
 0x1cb   :  { %v682_v45 = vmul.f32 %v740_v8, %v466_v42  ;;  %v468_v12 = vpop.f32.mrb[1].mxu1 }
 0x1cc   :  { %v683_v43 = vmul.f32 %v741_v9, %v468_v12 }
 0x1cd   :  { %v687_v13 = vadd.f32 %v686_v5, %v682_v45  ;;  %v695_v14 = vmul.f32 %v682_v45, %v466_v42 }
 0x1ce   :  { %v696_v16 = vmul.f32 %v683_v43, %v468_v12  ;;  %v537_v21 = vpop.f32.mrb[2].mxu0 }
 0x1cf   :  { %v700_v23 = vadd.f32 %v699_v7, %v695_v14  ;;  %v688_v28 = vadd.f32 %v687_v13, %v683_v43  ;;  %v684_v30 = vmul.f32 %v742_v48, %v537_v21  ;;  %v539_v31 = vpop.f32.mrb[3].mxu0 }
 0x1d0   :  { %v685_v34 = vmul.f32 %v743_v15, %v539_v31 }
 0x1d1   :  { %v701_v35 = vadd.f32 %v700_v23, %v696_v16  ;;  %v697_v36 = vmul.f32 %v684_v30, %v537_v21  ;;  %v689_v37 = vadd.f32 %v688_v28, %v684_v30 }
 0x1d2   :  { %v698_v27 = vmul.f32 %v685_v34, %v539_v31 }
 0x1d3   :  { %v690_v32 = vadd.f32 %v689_v37, %v685_v34  ;;  %v702_v29 = vadd.f32 %v701_v35, %v697_v36 }
 0x1d5   :  { %691 = vadd.xlane.f32.xlu1 %v690_v32  ;;  %v703_v33 = vadd.f32 %v702_v29, %v698_v27 }
 0x1d7   :  { %704 = vadd.xlane.f32.xlu0 %v703_v33 }
 0x262   :  { %v692_v38 = vpop.xlane.xlu1 %691 }
 0x263   :  { %v707_v39 = vsel %vm706_vm10, %v692_v38, 0.0 }
 0x264   :  { %v705_v17 = vpop.xlane.xlu0 %704 }
 0x265   :  { %v709_v11 = vsel %vm708_vm1, %v705_v17, 0.0 }
 0x266   :  { %v710_v24 = vadd.f32 %v709_v11, %v707_v39 }
 0x268   :  { %711 = vst [vmem:[#allocation8] sm:$0xff] %v710_v24 }
 0x269   :  { %969 = shalt.err (!%p966_p6)
}
 0x26a   :  { %s970_s5 = scalar_lea.hbm %s1375_s3, 128 }
 0x26b   :  { %p971_p7 = scmp.ne.s32.totalorder %s1375_s3, %s970_s5  ;;  %p974_p8 = scmp.lt.u32.totalorder %s970_s5, %s1375_s3 }
 0x26d   :  { %p976_p9 = pnand %p974_p8, %p971_p7 }
 0x26f   :  { %979 = shalt.err (!%p976_p9)
}
 0x270   :  { %721 = dma.vmem_to_hbm [thread:$0]  %s719_s28, 128, %s1375_s3, [#allocation4]  }
 0x271   :  { %984 = dma.done.wait [#allocation4], 128  }
 0x272   :  { %985 = vsyncadd [#allocation4], 4294967168 }
 0x273   :  { %725 = vsyncpa [#allocation3], 1 }
 0x274   :  { %726 = vsyncpa [#allocation6], 1 }
 0x275   :  { %727 = vsyncpa [#allocation4], 1 }

</bundles_post_ra>
